<compile_context>
chip_gen: v6e
topology: v6e:2x2x1
jax: 0.10.0
libtpu: 0.0.40
codegen_flags: <defaults>
</compile_context>

<pallas_src>
from functools import partial

import numpy as np
import jax
import jax.numpy as jnp
from jax import lax
from jax.experimental import pallas as pl
from jax.experimental.pallas import tpu as pltpu


# ----------------------------------------------------------------------------
# Kernel: 3x3 conv + bias for NB sublane-stacked images via one im2col GEMM,
# plus per-(image, channel) BatchNorm partial statistics.
# ----------------------------------------------------------------------------
def _conv_stats_kernel(x_ref, w_ref, b_ref, mask_ref, conv_ref, stats_ref,
                       p_ref, *, rows, wp, pal):
    # x_ref    : (NB*Cin,  Pal)       zero-padded planes, NB images in sublanes
    # w_ref    : (NB*Cout, 9*NB*Cin)  block-diagonal im2col weight matrix
    # b_ref    : (NB*Cout, 1)         conv bias, replicated per image
    # mask_ref : (1, Pal)             1.0 on valid output lanes, else 0.0
    # conv_ref : (NB*Cout, Pal)       conv+bias in padded-plane layout (lane dense)
    # stats_ref: (NB*Cout, 2)         [sum, sum_sq] of the bias-free conv
    # p_ref    : (9*NB*Cin, Pal)      VMEM scratch: im2col patch matrix
    x = x_ref[...]

    # im2col with static lane rotations only (XLU): tap (dh, dw) of the padded
    # plane is a left-rotation by dh*Wp + dw.  Each write is a full `rows`
    # sublane (8 here), Pal-lane unmasked store -- no (8,128)-crossing relayouts.
    for dh in range(3):
        for dw in range(3):
            t = dh * 3 + dw
            s = dh * wp + dw
            shifted = x if s == 0 else pltpu.roll(x, shift=pal - s, axis=1)
            p_ref[t * rows:(t + 1) * rows, :] = shifted

    # One K = 9*NB*Cin GEMM; spatial stays in lanes -> lane-dense result.
    acc = jnp.dot(w_ref[...], p_ref[...],
                  preferred_element_type=jnp.float32)        # (NB*Cout, Pal)

    # BN partial statistics on the bias-free accumulator (Var is shift
    # invariant; removing the bias offset reduces E[x^2]-E[x]^2 cancellation).
    # Mask excludes padded / roll-wrapped lanes.  Single (rows_out, 2) store.
    m = mask_ref[...]
    am = acc * m
    s1 = jnp.sum(am, axis=1, keepdims=True)
    s2 = jnp.sum(am * acc, axis=1, keepdims=True)
    stats_ref[...] = jnp.concatenate([s1, s2], axis=1)

    # Full lane-aligned slab store (Pal % 128 == 0 -> unmasked vst).
    conv_ref[...] = acc + b_ref[...]


# ----------------------------------------------------------------------------
# Wrapper: NCHW in, NCHW out.  Only wrapper data movement is the zero pad and
# the final fused (XLA) scale/shift/ReLU/crop read of the slab.
# ----------------------------------------------------------------------------
def excc_forward(x_nchw, w_oihw, bias, gamma, beta, eps=1e-5):
    N, Cin, H, W = x_nchw.shape
    Cout = w_oihw.shape[0]
    Hp, Wp = H + 2, W + 2
    Ppad = Hp * Wp                               # padded plane, flattened
    Pal = ((Ppad + 127) // 128) * 128            # lane-aligned plane width

    # Batch NB images per grid step, stacked along sublanes so small Cin still
    # fills 8 sublanes.  (With large N the grid extent stays >= 2, which also
    # feeds v7x's two TensorCores via the "parallel" grid axis.)
    NB = 2 if (N % 2 == 0 and Cin <= 4) else 1
    G = N // NB
    rows = NB * Cin

    f32 = jnp.float32
    x = x_nchw.astype(f32)
    # padding=1 halo; the flatten + group reshapes are contiguous (free).
    x_flat = jnp.pad(x, ((0, 0), (0, 0), (1, 1), (1, 1))).reshape(N, Cin, Ppad)
    x_flat = jnp.pad(x_flat, ((0, 0), (0, 0), (0, Pal - Ppad)))
    x_g = x_flat.reshape(G, rows, Pal)

    # Block-diagonal im2col weights: row (b*Cout + o), col (t*NB*Cin + b*Cin + c).
    w_flat = w_oihw.astype(f32).reshape(Cout, Cin, 9)        # [o, c, t]
    eye = jnp.eye(NB, dtype=f32)
    w_big = jnp.einsum('oct,bB->botBc', w_flat, eye).reshape(NB * Cout,
                                                             9 * NB * Cin)
    b_big = jnp.tile(bias.astype(f32).reshape(Cout, 1), (NB, 1))

    # Validity mask of the padded plane: output pixel (h, w) lives at lane
    # h*Wp + w, i.e. the top-left H x W corner of the Hp x Wp plane.
    mask_np = np.zeros((Hp, Wp), dtype=np.float32)
    mask_np[:H, :W] = 1.0
    mask_np = np.pad(mask_np.reshape(1, Ppad), ((0, 0), (0, Pal - Ppad)))
    mask = jnp.asarray(mask_np)

    kern = partial(_conv_stats_kernel, rows=rows, wp=Wp, pal=Pal)
    conv_slab, stats = pl.pallas_call(
        kern,
        grid=(G,),
        in_specs=[
            pl.BlockSpec((None, rows, Pal), lambda g: (g, 0, 0)),
            pl.BlockSpec((NB * Cout, 9 * rows), lambda g: (0, 0)),
            pl.BlockSpec((NB * Cout, 1), lambda g: (0, 0)),
            pl.BlockSpec((1, Pal), lambda g: (0, 0)),
        ],
        out_specs=(
            pl.BlockSpec((None, NB * Cout, Pal), lambda g: (g, 0, 0)),
            pl.BlockSpec((None, NB * Cout, 2), lambda g: (g, 0, 0)),
        ),
        out_shape=(
            jax.ShapeDtypeStruct((G, NB * Cout, Pal), f32),
            jax.ShapeDtypeStruct((G, NB * Cout, 2), f32),
        ),
        scratch_shapes=[pltpu.VMEM((9 * rows, Pal), f32)],
        compiler_params=pltpu.CompilerParams(
            dimension_semantics=("parallel",)),
    )(x_g, w_big, b_big, mask)

    # Tiny O(Cout) glue: reduce partials, fold BN into per-channel scale/shift.
    stats_n = stats.reshape(N, Cout, 2)
    count = jnp.float32(N * H * W)
    s1 = jnp.sum(stats_n[:, :, 0], axis=0)
    s2 = jnp.sum(stats_n[:, :, 1], axis=0)
    mean0 = s1 / count                                # mean of bias-free conv
    var = jnp.maximum(s2 / count - mean0 * mean0, 0.0)
    mean = mean0 + bias.astype(f32)                   # add the bias back (exact)
    scale = gamma.astype(f32) * lax.rsqrt(var + eps)
    shift = beta.astype(f32) - mean * scale

    # BN apply + ReLU + crop: one fused XLA pass over the lane-dense slab
    # (replaces the old Pallas pass 2 whose W=16 output forced masked stores).
    conv_hw = (conv_slab.reshape(N, Cout, Pal)[:, :, :Ppad]
               .reshape(N, Cout, Hp, Wp)[:, :, :H, :W])
    y = conv_hw * scale[None, :, None, None] + shift[None, :, None, None]
    return jnp.maximum(y, 0.0)                        # NCHW


excc_forward_jit = jax.jit(excc_forward)


def excc_reference(x_nchw, w_oihw, bias, gamma, beta, eps=1e-5):
    """Pure-JAX reference (same semantics as the PyTorch module in train mode)."""
    y = lax.conv_general_dilated(
        x_nchw.astype(jnp.float32), w_oihw.astype(jnp.float32),
        window_strides=(1, 1), padding="SAME",
        dimension_numbers=("NCHW", "OIHW", "NCHW"),
        precision=lax.Precision.HIGHEST)
    y = y + bias[None, :, None, None]
    mean = jnp.mean(y, axis=(0, 2, 3), keepdims=True)
    var = jnp.mean((y - mean) ** 2, axis=(0, 2, 3), keepdims=True)
    y = (y - mean) * lax.rsqrt(var + eps)
    y = y * gamma[None, :, None, None] + beta[None, :, None, None]
    return jnp.maximum(y, 0.0)


if __name__ == "__main__":
    # Small deterministic setup: N=2, in_ch=4, out_ch=8, H=W=16.
    N, Cin, Cout, H, W = 2, 4, 8, 16, 16
    key = jax.random.PRNGKey(0)
    kx, kw, kb = jax.random.split(key, 3)

    x = jax.random.normal(kx, (N, Cin, H, W), dtype=jnp.float32)
    w = jax.random.normal(kw, (Cout, Cin, 3, 3), dtype=jnp.float32) * 0.1
    b = jax.random.normal(kb, (Cout,), dtype=jnp.float32) * 0.1
    gamma = jnp.ones((Cout,), dtype=jnp.float32)   # BN default init
    beta = jnp.zeros((Cout,), dtype=jnp.float32)

    out = jax.block_until_ready(excc_forward_jit(x, w, b, gamma, beta))
    ref = jax.block_until_ready(excc_reference(x, w, b, gamma, beta))

    assert out.shape == (N, Cout, H, W)
    # The in-kernel GEMM runs at the MXU's default f32 precision while the
    # reference uses Precision.HIGHEST; 1e-3 covers that gap with margin
    # (observed error is ~1e-5 at these magnitudes).
    err = float(jnp.max(jnp.abs(out - ref)))
    assert jnp.allclose(out, ref, atol=1e-3, rtol=1e-3), err

    print("KERNEL_OK")
</pallas_src>

<mosaic_0001>
module attributes {stable_mosaic.version = 11 : i64} {
  func.func @_conv_stats_kernel(%arg0: i32, %arg1: memref<1x8x384xf32, #tpu.memory_space<vmem>>, %arg2: memref<16x72xf32, #tpu.memory_space<vmem>>, %arg3: memref<16x1xf32, #tpu.memory_space<vmem>>, %arg4: memref<1x384xf32, #tpu.memory_space<vmem>>, %arg5: memref<1x16x384xf32, #tpu.memory_space<vmem>>, %arg6: memref<1x16x2xf32, #tpu.memory_space<vmem>>, %arg7: memref<72x384xf32, #tpu.memory_space<vmem>>) attributes {dimension_semantics = [#tpu.dimension_semantics<parallel>], iteration_bounds = array<i64: 1>, scalar_prefetch = 0 : i64, scratch_operands = 1 : i64, tpu.core_type = #tpu.core_type<tc>, window_params = [{transform_indices = @transform_0, window_bounds = array<i64: 1, 8, 384>}, {pipeline_mode = #tpu.pipeline_mode<synchronous>, transform_indices = @transform_1, window_bounds = array<i64: 16, 72>}, {pipeline_mode = #tpu.pipeline_mode<synchronous>, transform_indices = @transform_2, window_bounds = array<i64: 16, 1>}, {pipeline_mode = #tpu.pipeline_mode<synchronous>, transform_indices = @transform_3, window_bounds = array<i64: 1, 384>}, {transform_indices = @transform_4, window_bounds = array<i64: 1, 16, 384>}, {transform_indices = @transform_5, window_bounds = array<i64: 1, 16, 2>}]} {
    %c0 = arith.constant 0 : index
    %c0_0 = arith.constant 0 : index
    %c0_1 = arith.constant 0 : index
    %0 = vector.load %arg1[%c0, %c0_0, %c0_1] : memref<1x8x384xf32, #tpu.memory_space<vmem>>, vector<1x8x384xf32>
    %1 = vector.shape_cast %0 : vector<1x8x384xf32> to vector<8x384xf32>
    %c0_2 = arith.constant 0 : index
    %c0_3 = arith.constant 0 : index
    %2 = vector.load %arg7[%c0_2, %c0_3] : memref<72x384xf32, #tpu.memory_space<vmem>>, vector<8x384xf32>
    tpu.vector_store %arg7[%c0_2, %c0_3], %1 {strides = array<i32>} : memref<72x384xf32, #tpu.memory_space<vmem>>, vector<8x384xf32>,
    %c383_i32 = arith.constant 383 : i32
    %3 = tpu.dynamic_rotate %1 by %c383_i32 dim 1 : vector<8x384xf32>, i32 -> vector<8x384xf32>
    %c8 = arith.constant 8 : index
    %c0_4 = arith.constant 0 : index
    %4 = vector.load %arg7[%c8, %c0_4] : memref<72x384xf32, #tpu.memory_space<vmem>>, vector<8x384xf32>
    tpu.vector_store %arg7[%c8, %c0_4], %3 {strides = array<i32>} : memref<72x384xf32, #tpu.memory_space<vmem>>, vector<8x384xf32>,
    %c382_i32 = arith.constant 382 : i32
    %5 = tpu.dynamic_rotate %1 by %c382_i32 dim 1 : vector<8x384xf32>, i32 -> vector<8x384xf32>
    %c16 = arith.constant 16 : index
    %c0_5 = arith.constant 0 : index
    %6 = vector.load %arg7[%c16, %c0_5] : memref<72x384xf32, #tpu.memory_space<vmem>>, vector<8x384xf32>
    tpu.vector_store %arg7[%c16, %c0_5], %5 {strides = array<i32>} : memref<72x384xf32, #tpu.memory_space<vmem>>, vector<8x384xf32>,
    %c366_i32 = arith.constant 366 : i32
    %7 = tpu.dynamic_rotate %1 by %c366_i32 dim 1 : vector<8x384xf32>, i32 -> vector<8x384xf32>
    %c24 = arith.constant 24 : index
    %c0_6 = arith.constant 0 : index
    %8 = vector.load %arg7[%c24, %c0_6] : memref<72x384xf32, #tpu.memory_space<vmem>>, vector<8x384xf32>
    tpu.vector_store %arg7[%c24, %c0_6], %7 {strides = array<i32>} : memref<72x384xf32, #tpu.memory_space<vmem>>, vector<8x384xf32>,
    %c365_i32 = arith.constant 365 : i32
    %9 = tpu.dynamic_rotate %1 by %c365_i32 dim 1 : vector<8x384xf32>, i32 -> vector<8x384xf32>
    %c32 = arith.constant 32 : index
    %c0_7 = arith.constant 0 : index
    %10 = vector.load %arg7[%c32, %c0_7] : memref<72x384xf32, #tpu.memory_space<vmem>>, vector<8x384xf32>
    tpu.vector_store %arg7[%c32, %c0_7], %9 {strides = array<i32>} : memref<72x384xf32, #tpu.memory_space<vmem>>, vector<8x384xf32>,
    %c364_i32 = arith.constant 364 : i32
    %11 = tpu.dynamic_rotate %1 by %c364_i32 dim 1 : vector<8x384xf32>, i32 -> vector<8x384xf32>
    %c40 = arith.constant 40 : index
    %c0_8 = arith.constant 0 : index
    %12 = vector.load %arg7[%c40, %c0_8] : memref<72x384xf32, #tpu.memory_space<vmem>>, vector<8x384xf32>
    tpu.vector_store %arg7[%c40, %c0_8], %11 {strides = array<i32>} : memref<72x384xf32, #tpu.memory_space<vmem>>, vector<8x384xf32>,
    %c348_i32 = arith.constant 348 : i32
    %13 = tpu.dynamic_rotate %1 by %c348_i32 dim 1 : vector<8x384xf32>, i32 -> vector<8x384xf32>
    %c48 = arith.constant 48 : index
    %c0_9 = arith.constant 0 : index
    %14 = vector.load %arg7[%c48, %c0_9] : memref<72x384xf32, #tpu.memory_space<vmem>>, vector<8x384xf32>
    tpu.vector_store %arg7[%c48, %c0_9], %13 {strides = array<i32>} : memref<72x384xf32, #tpu.memory_space<vmem>>, vector<8x384xf32>,
    %c347_i32 = arith.constant 347 : i32
    %15 = tpu.dynamic_rotate %1 by %c347_i32 dim 1 : vector<8x384xf32>, i32 -> vector<8x384xf32>
    %c56 = arith.constant 56 : index
    %c0_10 = arith.constant 0 : index
    %16 = vector.load %arg7[%c56, %c0_10] : memref<72x384xf32, #tpu.memory_space<vmem>>, vector<8x384xf32>
    tpu.vector_store %arg7[%c56, %c0_10], %15 {strides = array<i32>} : memref<72x384xf32, #tpu.memory_space<vmem>>, vector<8x384xf32>,
    %c346_i32 = arith.constant 346 : i32
    %17 = tpu.dynamic_rotate %1 by %c346_i32 dim 1 : vector<8x384xf32>, i32 -> vector<8x384xf32>
    %c64 = arith.constant 64 : index
    %c0_11 = arith.constant 0 : index
    %18 = vector.load %arg7[%c64, %c0_11] : memref<72x384xf32, #tpu.memory_space<vmem>>, vector<8x384xf32>
    tpu.vector_store %arg7[%c64, %c0_11], %17 {strides = array<i32>} : memref<72x384xf32, #tpu.memory_space<vmem>>, vector<8x384xf32>,
    %c0_12 = arith.constant 0 : index
    %c0_13 = arith.constant 0 : index
    %19 = vector.load %arg2[%c0_12, %c0_13] : memref<16x72xf32, #tpu.memory_space<vmem>>, vector<16x72xf32>
    %c0_14 = arith.constant 0 : index
    %c0_15 = arith.constant 0 : index
    %20 = vector.load %arg7[%c0_14, %c0_15] : memref<72x384xf32, #tpu.memory_space<vmem>>, vector<72x384xf32>
    %cst = arith.constant dense<0.000000e+00> : vector<16x384xf32>
    %21 = tpu.matmul %19, %20, %cst {dimension_numbers = #tpu.dot_dimension_numbers<[1], [0], [0], [1], [0, 0, 1, 1], [], []>} : vector<16x72xf32>, vector<72x384xf32>, vector<16x384xf32> -> vector<16x384xf32>
    %c0_16 = arith.constant 0 : index
    %c0_17 = arith.constant 0 : index
    %22 = vector.load %arg4[%c0_16, %c0_17] : memref<1x384xf32, #tpu.memory_space<vmem>>, vector<1x384xf32>
    %23 = vector.broadcast %22 : vector<1x384xf32> to vector<16x384xf32>
    %24 = arith.mulf %21, %23 : vector<16x384xf32>
    %cst_18 = arith.constant dense<0.000000e+00> : vector<16xf32>
    %25 = vector.multi_reduction <add>, %24, %cst_18 [1] : vector<16x384xf32> to vector<16xf32>
    %26 = vector.shape_cast %25 : vector<16xf32> to vector<16x1xf32>
    %27 = arith.mulf %24, %21 : vector<16x384xf32>
    %cst_19 = arith.constant dense<0.000000e+00> : vector<16xf32>
    %28 = vector.multi_reduction <add>, %27, %cst_19 [1] : vector<16x384xf32> to vector<16xf32>
    %29 = vector.shape_cast %28 : vector<16xf32> to vector<16x1xf32>
    %30 = tpu.concatenate %26, %29 in 1 : vector<16x1xf32>, vector<16x1xf32> -> vector<16x2xf32>
    %c0_20 = arith.constant 0 : index
    %c0_21 = arith.constant 0 : index
    %c0_22 = arith.constant 0 : index
    %31 = vector.load %arg6[%c0_20, %c0_21, %c0_22] : memref<1x16x2xf32, #tpu.memory_space<vmem>>, vector<1x16x2xf32>
    %32 = vector.shape_cast %31 : vector<1x16x2xf32> to vector<16x2xf32>
    %33 = vector.shape_cast %30 : vector<16x2xf32> to vector<1x16x2xf32>
    tpu.vector_store %arg6[%c0_20, %c0_21, %c0_22], %33 {strides = array<i32>} : memref<1x16x2xf32, #tpu.memory_space<vmem>>, vector<1x16x2xf32>,
    %c0_23 = arith.constant 0 : index
    %c0_24 = arith.constant 0 : index
    %34 = vector.load %arg3[%c0_23, %c0_24] : memref<16x1xf32, #tpu.memory_space<vmem>>, vector<16x1xf32>
    %35 = vector.broadcast %34 : vector<16x1xf32> to vector<16x384xf32>
    %36 = arith.addf %21, %35 : vector<16x384xf32>
    %c0_25 = arith.constant 0 : index
    %c0_26 = arith.constant 0 : index
    %c0_27 = arith.constant 0 : index
    %37 = vector.load %arg5[%c0_25, %c0_26, %c0_27] : memref<1x16x384xf32, #tpu.memory_space<vmem>>, vector<1x16x384xf32>
    %38 = vector.shape_cast %37 : vector<1x16x384xf32> to vector<16x384xf32>
    %39 = vector.shape_cast %36 : vector<16x384xf32> to vector<1x16x384xf32>
    tpu.vector_store %arg5[%c0_25, %c0_26, %c0_27], %39 {strides = array<i32>} : memref<1x16x384xf32, #tpu.memory_space<vmem>>, vector<1x16x384xf32>,
    return
  }
  func.func @transform_0(%arg0: i32) -> (i32, i32, i32) {
    %c0_i32 = arith.constant 0 : i32
    %c0_i32_0 = arith.constant 0 : i32
    %c0_i32_1 = arith.constant 0 : i32
    return %arg0, %c0_i32, %c0_i32_0 : i32, i32, i32
  }
  func.func @transform_1(%arg0: i32) -> (i32, i32) {
    %c0_i32 = arith.constant 0 : i32
    %c0_i32_0 = arith.constant 0 : i32
    %c0_i32_1 = arith.constant 0 : i32
    return %c0_i32, %c0_i32_0 : i32, i32
  }
  func.func @transform_2(%arg0: i32) -> (i32, i32) {
    %c0_i32 = arith.constant 0 : i32
    %c0_i32_0 = arith.constant 0 : i32
    %c0_i32_1 = arith.constant 0 : i32
    return %c0_i32, %c0_i32_0 : i32, i32
  }
  func.func @transform_3(%arg0: i32) -> (i32, i32) {
    %c0_i32 = arith.constant 0 : i32
    %c0_i32_0 = arith.constant 0 : i32
    %c0_i32_1 = arith.constant 0 : i32
    return %c0_i32, %c0_i32_0 : i32, i32
  }
  func.func @transform_4(%arg0: i32) -> (i32, i32, i32) {
    %c0_i32 = arith.constant 0 : i32
    %c0_i32_0 = arith.constant 0 : i32
    %c0_i32_1 = arith.constant 0 : i32
    return %arg0, %c0_i32, %c0_i32_0 : i32, i32, i32
  }
  func.func @transform_5(%arg0: i32) -> (i32, i32, i32) {
    %c0_i32 = arith.constant 0 : i32
    %c0_i32_0 = arith.constant 0 : i32
    %c0_i32_1 = arith.constant 0 : i32
    return %arg0, %c0_i32, %c0_i32_0 : i32, i32, i32
  }
}

</mosaic_0001>

<bundles_post_ra>
// kernel: excc_forward.1
= control target key start
LH: loop header
LB: loop body
LE: loop exit
PB: predicated region body
PF: predicated region fallthrough
CT: control target
= control target key end

     0   :  { %s450_s22 = smov 90   ;;  %s451_s25 = smov 91   ;;  %vm160_vm0 = vcmask 588800   ;;  %v456_v4 = vmov 0.0   ;;  %v31_v5 = vlaneseq  ;;  %v459_v56 = vmov 0   ;;  %s594_s0 = inlined_call_operand.vmem [shape: f32[1,8,384], index: 0, kind: input, shape index: {}]   ;;  %s595_s1 = inlined_call_operand.vmem [shape: f32[16,72], index: 1, kind: input, shape index: {}]   ;;  %s596_s3 = inlined_call_operand.vmem [shape: f32[1,384], index: 3, kind: input, shape index: {}]   ;;  %s597_s2 = inlined_call_operand.vmem [shape: f32[16,1], index: 2, kind: input, shape index: {}]   ;;  %s598_s5 = inlined_call_operand.vmem [shape: f32[1,16,2], index: 5, kind: output, shape index: {1}]   ;;  %s599_s4 = inlined_call_operand.vmem [shape: f32[1,16,384], index: 4, kind: output, shape index: {0}]  }
   0x1   :  { %v493_v0 = vld [vmem:[%s594_s0 + $0x8] sm:$0xff]  ;;  %v498_v1 = vld [vmem:[%s594_s0] sm:$0xff]  ;;  %v505_v2 = vld [vmem:[%s594_s0 + $0x10] sm:$0xff]  ;;  %s452_s26 = smov 92   ;;  %s453_s27 = smov 108   ;;  %231 = vmatprep.mubr.f32.mxu0 %v456_v4  ;;  %448 = vset.pattern.permute.xlu1 %v459_v56  ;;  %vm364_vm9 = vcmask 7168  }
   0x2   :  { %120 = vrot.lane.b32.xlu0 %v493_v0, %s450_s22  ;;  %118 = vrot.lane.b32.xlu1 %v498_v1, %s450_s22  ;;  %s454_s0 = smov 109   ;;  %s455_s28 = smov 110   ;;  %v526_v3 = vld [vmem:[%s595_s1] sm:$0xff]  ;;  %v538_v6 = vand.u32 127, %v31_v5  ;;  %v132_v55 = vld [vmem:[%s595_s1 + $0x8] sm:$0xff]  ;;  %v322_v57 = vshrl.u32 %v31_v5, 7 }
   0x3   :  { %435 = vmatprep.mubr.msk.f32.mxu1 %vm160_vm0, %v526_v3  ;;  %s457_s6 = smov 126   ;;  %s458_s7 = smov 127   ;;  %449 = vset.pattern.permute.xlu0 %v459_v56  ;;  %v319_v59 = vld [vmem:[%s596_s3] sm:$0x7]  ;;  %vm367_vm10 = vcmask 15360  }
   0x4   :  { %vm124_vm1 = vcmp.lt.s32.totalorder %v538_v6, 90  ;;  %vm111_vm2 = vcmp.lt.s32.totalorder %v538_v6, 91  ;;  %vm98_vm3 = vcmp.lt.s32.totalorder %v538_v6, 92  ;;  %vm85_vm4 = vcmp.lt.s32.totalorder %v538_v6, 108 }
   0x5   :  { %vm72_vm5 = vcmp.lt.s32.totalorder %v538_v6, 109  ;;  %vm59_vm6 = vcmp.lt.s32.totalorder %v538_v6, 110  ;;  %vm46_vm7 = vcmp.lt.s32.totalorder %v538_v6, 126  ;;  %vm33_vm8 = vcmp.lt.s32.totalorder %v538_v6, 127 }
   0x6   :  { %122 = vrot.lane.b32.xlu0 %v505_v2, %s450_s22  ;;  %107 = vrot.lane.b32.xlu1 %v493_v0, %s451_s25  ;;  %v323_v58 = vsub.s32 0, %v322_v57  ;;  %v327_v60 = vsub.s32 1, %v322_v57  ;;  %v331_v63 = vsub.s32 2, %v322_v57 }
   0x8   :  { %v324_v61 = vrot.slane %v319_v59, %v323_v58  ;;  %v328_v62 = vrot.slane %v319_v59, %v327_v60 }
   0xa   :  { %109 = vrot.lane.b32.xlu0 %v505_v2, %s451_s25  ;;  %105 = vrot.lane.b32.xlu1 %v498_v1, %s451_s25 }
   0xe   :  { %94 = vrot.lane.b32.xlu0 %v493_v0, %s452_s26  ;;  %96 = vrot.lane.b32.xlu1 %v505_v2, %s452_s26 }
  0x12   :  { %92 = vrot.lane.b32.xlu0 %v498_v1, %s452_s26  ;;  %81 = vrot.lane.b32.xlu1 %v493_v0, %s453_s27 }
  0x16   :  { %83 = vrot.lane.b32.xlu0 %v505_v2, %s453_s27  ;;  %79 = vrot.lane.b32.xlu1 %v498_v1, %s453_s27 }
  0x1a   :  { %68 = vrot.lane.b32.xlu0 %v493_v0, %s454_s0  ;;  %70 = vrot.lane.b32.xlu1 %v505_v2, %s454_s0 }
  0x1e   :  { %66 = vrot.lane.b32.xlu0 %v498_v1, %s454_s0  ;;  %55 = vrot.lane.b32.xlu1 %v493_v0, %s455_s28 }
  0x22   :  { %57 = vrot.lane.b32.xlu0 %v505_v2, %s455_s28  ;;  %53 = vrot.lane.b32.xlu1 %v498_v1, %s455_s28 }
  0x26   :  { %42 = vrot.lane.b32.xlu0 %v493_v0, %s457_s6  ;;  %44 = vrot.lane.b32.xlu1 %v505_v2, %s457_s6 }
  0x2a   :  { %40 = vrot.lane.b32.xlu0 %v498_v1, %s457_s6  ;;  %27 = vrot.lane.b32.xlu1 %v493_v0, %s458_s7 }
  0x2e   :  { %29 = vrot.lane.b32.xlu0 %v505_v2, %s458_s7  ;;  %25 = vrot.lane.b32.xlu1 %v498_v1, %s458_s7 }
  0x74   :  { %v121_v7 = vpop.permute.xlu0 %120  ;;  %v119_v8 = vpop.permute.xlu1 %118 }
  0x75   :  { %v126_v13 = vsel %vm124_vm1, %v119_v8, %v121_v7 }
  0x78   :  { %v123_v9 = vpop.permute.xlu0 %122  ;;  %v108_v10 = vpop.permute.xlu1 %107 }
  0x79   :  { %v125_v11 = vsel %vm124_vm1, %v121_v7, %v123_v9  ;;  %v127_v12 = vsel %vm124_vm1, %v123_v9, %v119_v8  ;;  %v332_v7 = vrot.slane %v319_v59, %v331_v63 }
  0x7a   :  { %181 = vmatprep.subr.mxu0 %v125_v11  ;;  %417 = vmatprep.subr.mxu1 %v127_v12 }
  0x7b   :  { %182 = vmatpush1.msra.mxu0 %v126_v13  ;;  %418 = vmatpush3.msra.mxu1 %v127_v12 }
  0x7c   :  { %v110_v14 = vpop.permute.xlu0 %109  ;;  %v106_v15 = vpop.permute.xlu1 %105 }
  0x7d   :  { %v112_v16 = vsel %vm111_vm2, %v108_v10, %v110_v14  ;;  %v114_v17 = vsel %vm111_vm2, %v110_v14, %v106_v15  ;;  %v113_v18 = vsel %vm111_vm2, %v106_v15, %v108_v10 }
  0x7e   :  { %183 = vmatprep.subr.mxu0 %v112_v16  ;;  %419 = vmatprep.subr.mxu1 %v114_v17 }
  0x7f   :  { %184 = vmatpush1.msra.mxu0 %v113_v18  ;;  %420 = vmatpush3.msra.mxu1 %v114_v17 }
  0x80   :  { %v95_v19 = vpop.permute.xlu0 %94  ;;  %v97_v20 = vpop.permute.xlu1 %96 }
  0x81   :  { %v99_v21 = vsel %vm98_vm3, %v95_v19, %v97_v20 }
  0x82   :  { %185 = vmatprep.subr.mxu0 %v99_v21 }
  0x84   :  { %v93_v22 = vpop.permute.xlu0 %92  ;;  %v82_v23 = vpop.permute.xlu1 %81 }
  0x85   :  { %v100_v24 = vsel %vm98_vm3, %v93_v22, %v95_v19  ;;  %v101_v25 = vsel %vm98_vm3, %v97_v20, %v93_v22 }
  0x86   :  { %186 = vmatpush1.msra.mxu0 %v100_v24  ;;  %421 = vmatprep.subr.mxu1 %v101_v25 }
  0x87   :  { %422 = vmatpush3.msra.mxu1 %v101_v25 }
  0x88   :  { %v84_v26 = vpop.permute.xlu0 %83  ;;  %v80_v27 = vpop.permute.xlu1 %79 }
  0x89   :  { %v86_v28 = vsel %vm85_vm4, %v82_v23, %v84_v26  ;;  %v88_v29 = vsel %vm85_vm4, %v84_v26, %v80_v27  ;;  %v87_v30 = vsel %vm85_vm4, %v80_v27, %v82_v23  ;;  %v370_v27 = vld [vmem:[%s597_s2] sm:$0xff] }
  0x8a   :  { %187 = vmatprep.subr.mxu0 %v86_v28  ;;  %423 = vmatprep.subr.mxu1 %v88_v29  ;;  %v371_v28 = vld [vmem:[%s597_s2 + $0x8] sm:$0xff] }
  0x8b   :  { %188 = vmatpush1.msra.mxu0 %v87_v30  ;;  %424 = vmatpush3.msra.mxu1 %v88_v29 }
  0x8c   :  { %v69_v31 = vpop.permute.xlu0 %68  ;;  %v71_v32 = vpop.permute.xlu1 %70 }
  0x8d   :  { %v73_v33 = vsel %vm72_vm5, %v69_v31, %v71_v32 }
  0x8e   :  { %189 = vmatprep.subr.mxu0 %v73_v33 }
  0x90   :  { %v67_v34 = vpop.permute.xlu0 %66  ;;  %v56_v35 = vpop.permute.xlu1 %55 }
  0x91   :  { %v74_v36 = vsel %vm72_vm5, %v67_v34, %v69_v31  ;;  %v75_v37 = vsel %vm72_vm5, %v71_v32, %v67_v34 }
  0x92   :  { %190 = vmatpush1.msra.mxu0 %v74_v36  ;;  %425 = vmatprep.subr.mxu1 %v75_v37 }
  0x93   :  { %426 = vmatpush3.msra.mxu1 %v75_v37 }
  0x94   :  { %v58_v38 = vpop.permute.xlu0 %57  ;;  %v54_v39 = vpop.permute.xlu1 %53 }
  0x95   :  { %v60_v40 = vsel %vm59_vm6, %v56_v35, %v58_v38  ;;  %v62_v41 = vsel %vm59_vm6, %v58_v38, %v54_v39  ;;  %v61_v42 = vsel %vm59_vm6, %v54_v39, %v56_v35 }
  0x96   :  { %191 = vmatprep.subr.mxu0 %v60_v40  ;;  %427 = vmatprep.subr.mxu1 %v62_v41 }
  0x97   :  { %192 = vmatpush1.msra.mxu0 %v61_v42  ;;  %428 = vmatpush3.msra.mxu1 %v62_v41 }
  0x98   :  { %v43_v43 = vpop.permute.xlu0 %42  ;;  %v45_v44 = vpop.permute.xlu1 %44 }
  0x99   :  { %v47_v45 = vsel %vm46_vm7, %v43_v43, %v45_v44 }
  0x9a   :  { %193 = vmatprep.subr.mxu0 %v47_v45 }
  0x9c   :  { %v41_v46 = vpop.permute.xlu0 %40  ;;  %v28_v47 = vpop.permute.xlu1 %27 }
  0x9d   :  { %v48_v48 = vsel %vm46_vm7, %v41_v46, %v43_v43  ;;  %v49_v49 = vsel %vm46_vm7, %v45_v44, %v41_v46 }
  0x9e   :  { %194 = vmatpush1.msra.mxu0 %v48_v48  ;;  %429 = vmatprep.subr.mxu1 %v49_v49 }
  0x9f   :  { %430 = vmatpush3.msra.mxu1 %v49_v49 }
  0xa0   :  { %v30_v50 = vpop.permute.xlu0 %29  ;;  %v26_v51 = vpop.permute.xlu1 %25 }
  0xa1   :  { %v34_v52 = vsel %vm33_vm8, %v28_v47, %v30_v50  ;;  %v36_v53 = vsel %vm33_vm8, %v30_v50, %v26_v51  ;;  %v35_v54 = vsel %vm33_vm8, %v26_v51, %v28_v47 }
  0xa2   :  { %195 = vmatprep.subr.mxu0 %v34_v52  ;;  %431 = vmatprep.subr.mxu1 %v36_v53 }
  0xa3   :  { %196 = vmatpush1.msra.mxu0 %v35_v54  ;;  %432 = vmatpush3.msra.mxu1 %v36_v53 }
  0xa4   :  { %197 = vmatprep.subr.mxu0 %v493_v0  ;;  %433 = vmatprep.subr.mxu1 %v505_v2 }
  0xa5   :  { %198 = vmatpush1.msra.mxu0 %v498_v1  ;;  %434 = vmatpush3.msra.mxu1 %v505_v2 }
  0xa6   :  { %402 = vmatmul.mubr.msk.f32.vlgmr.msra.gmra.mxu0 %vm160_vm0, %v526_v3  ;;  %436 = vmatmul.mubr.msk.f32.vlgmr.msra.gmra.mxu1 %vm160_vm0, %v132_v55 }
  0xa7   :  { %237 = vmatprep.mubr.f32.mxu0 %v456_v4 }
  0xaa   :  { %403 = vmatmul.mubr.msk.f32.gmra.mxu0 %vm160_vm0, %v132_v55 }
 0x166   :  { %v233_v0 = vpop.f32.mrf.mxu0  ;;  %v437_v1 = vpop.f32.mrf.mxu1 }
 0x167   :  { %v336_v2 = vmul.f32 %v324_v61, %v233_v0  ;;  %v341_v17 = vmul.f32 %v437_v1, %v332_v7 }
 0x168   :  { %v235_v3 = vpop.f32.mrf.mxu0  ;;  %v310_v4 = vpop.f32.mrf.mxu1 }
 0x169   :  { %v337_v6 = vmul.f32 %v328_v62, %v235_v3  ;;  %v350_v8 = vmul.f32 %v336_v2, %v233_v0  ;;  %v338_v5 = vmul.f32 %v332_v7, %v310_v4  ;;  %v355_v25 = vmul.f32 %v437_v1, %v341_v17 }
 0x16a   :  { %v239_v9 = vpop.f32.mrf.mxu0 }
 0x16b   :  { %v351_v10 = vmul.f32 %v337_v6, %v235_v3  ;;  %v339_v11 = vmul.f32 %v324_v61, %v239_v9  ;;  %v342_v12 = vadd.f32 %v337_v6, %v336_v2  ;;  %v352_v18 = vmul.f32 %v338_v5, %v310_v4 }
 0x16c   :  { %v241_v13 = vpop.f32.mrf.mxu0 }
 0x16d   :  { %v340_v14 = vmul.f32 %v328_v62, %v241_v13  ;;  %v343_v15 = vadd.f32 %v342_v12, %v338_v5  ;;  %v356_v16 = vadd.f32 %v351_v10, %v350_v8  ;;  %v353_v19 = vmul.f32 %v339_v11, %v239_v9 }
 0x16f   :  { %v354_v20 = vmul.f32 %v340_v14, %v241_v13  ;;  %344 = vadd.xlane.f32.xlu0 %v343_v15  ;;  %v346_v21 = vadd.f32 %v340_v14, %v339_v11  ;;  %v357_v22 = vadd.f32 %v356_v16, %v352_v18 }
 0x171   :  { %v347_v23 = vadd.f32 %v346_v21, %v341_v17  ;;  %v360_v24 = vadd.f32 %v354_v20, %v353_v19 }
 0x173   :  { %358 = vadd.xlane.f32.xlu0 %v357_v22  ;;  %348 = vadd.xlane.f32.xlu1 %v347_v23  ;;  %v361_v26 = vadd.f32 %v360_v24, %v355_v25 }
 0x177   :  { %362 = vadd.xlane.f32.xlu0 %v361_v26 }
 0x184   :  { %374 = vperm.xlu1 %448, %v370_v27  }
 0x18d   :  { %379 = vperm.xlu0 %449, %v371_v28  }
 0x1f8   :  { %v345_v29 = vpop.xlane.xlu0 %344 }
 0x1fc   :  { %v359_v30 = vpop.xlane.xlu0 %358  ;;  %v349_v31 = vpop.xlane.xlu1 %348 }
 0x1fd   :  { %v365_v32 = vsel %vm364_vm9, %v345_v29, %v359_v30 }
 0x1fe   :  { %368 = vst.msk [vmem:[%s598_s5] sm:$0xff] %vm367_vm10, %v365_v32 }
 0x200   :  { %v363_v33 = vpop.xlane.xlu0 %362  ;;  %v375_v34 = vpop.permute.xlu1 %374 }
 0x201   :  { %v366_v35 = vsel %vm364_vm9, %v349_v31, %v363_v33  ;;  %v382_v36 = vadd.f32 %v375_v34, %v233_v0  ;;  %v383_v37 = vadd.f32 %v375_v34, %v235_v3  ;;  %v384_v38 = vadd.f32 %v375_v34, %v310_v4 }
 0x202   :  { %369 = vst.msk [vmem:[%s598_s5 + $0x8] sm:$0xff] %vm367_vm10, %v366_v35 }
 0x203   :  { %388 = vst [vmem:[%s599_s4] sm:$0xff] %v382_v36  ;;  %389 = vst [vmem:[%s599_s4 + $0x8] sm:$0xff] %v383_v37 }
 0x204   :  { %390 = vst [vmem:[%s599_s4 + $0x10] sm:$0xff] %v384_v38 }
 0x208   :  { %v380_v39 = vpop.permute.xlu0 %379 }
 0x209   :  { %v385_v40 = vadd.f32 %v380_v39, %v239_v9  ;;  %v386_v41 = vadd.f32 %v380_v39, %v241_v13  ;;  %v387_v42 = vadd.f32 %v437_v1, %v380_v39 }
 0x20b   :  { %391 = vst [vmem:[%s599_s4 + $0x18] sm:$0xff] %v385_v40  ;;  %392 = vst [vmem:[%s599_s4 + $0x20] sm:$0xff] %v386_v41 }
 0x20c   :  { %393 = vst [vmem:[%s599_s4 + $0x28] sm:$0xff] %v387_v42 }

</bundles_post_ra>
